<compile_context>
chip_gen: v7x
topology: tpu7x:2x2x1
jax: 0.10.0
libtpu: 0.0.40
codegen_flags: <defaults>
</compile_context>

<pallas_src>
import functools

import jax
import jax.numpy as jnp
from jax import lax
from jax.experimental import pallas as pl
from jax.experimental.pallas import tpu as pltpu


_TILE_CANDIDATES = (2048, 1024, 512, 256, 128)
_LANE = 128
_WEIGHT_BLOCK_VMEM_CAP = 24 * 2**20   # double-buffered weight blocks budget
_VMEM_LIMIT_CAP = 48 * 2**20          # headroom under v7x's 64 MiB physical


def _round_up(x, m):
    return (x + m - 1) // m * m


def _pick_tile(dim, max_tile=2048, max_pad_frac=0.25):
    """Largest lane-aligned tile whose zero padding of `dim` stays acceptable.

    Bigger blocks cut the ~0.35 us per-grid-step overhead; excessive padding
    would add HBM weight traffic on this memory-bound GEMV, so cap it.
    """
    dim = max(int(dim), 1)
    limit = max(_round_up(dim, _LANE), int(dim * (1.0 + max_pad_frac)))
    for c in _TILE_CANDIDATES:                    # descending -> first hit is largest
        if c <= max_tile and _round_up(dim, c) <= limit:
            return c
    return _LANE


def _sublane_pack(dtype):
    # Rows per fully-packed vreg sublane group: f32 -> 8, bf16 -> 16, int8 -> 32.
    return 8 * (4 // jnp.dtype(dtype).itemsize)


def _rnn_cell_kernel(x_ref, h_ref, w_ref, scale_ref, b_ref, o_ref, acc_ref, *,
                     n_kx):
    """out = tanh(([x, h] @ [Wx^T ; Wh^T]) * scale + (bx + bh)).

    Grid = (N tiles of hidden, K tiles of the stacked contraction).  The K
    axis walks the x-region chunks first (k < n_kx), then the h-region chunks.
    f32 VMEM accumulator across K; scale/bias/tanh epilogue runs on the last
    K step only (VPU/EUP slots, free under the MXU / weight-DMA bound).
    """
    k = pl.program_id(1)

    @pl.when(k == 0)
    def _():
        acc_ref[...] = jnp.zeros_like(acc_ref)

    w = w_ref[...]
    if w.dtype != x_ref.dtype:
        # Low-precision (int8) weights: dequantize in-registers.  The HBM
        # stream (the binding resource for this small-batch GEMV) already got
        # the 2-4x reduction; the cast rides otherwise-idle VPU slots.
        w = w.astype(jnp.float32).astype(x_ref.dtype)

    @pl.when(k < n_kx)
    def _():
        acc_ref[...] += jnp.dot(x_ref[...], w,
                                preferred_element_type=jnp.float32)

    @pl.when(k >= n_kx)
    def _():
        acc_ref[...] += jnp.dot(h_ref[...], w,
                                preferred_element_type=jnp.float32)

    @pl.when(k == pl.num_programs(1) - 1)
    def _():
        o_ref[...] = jnp.tanh(
            acc_ref[...] * scale_ref[...] + b_ref[...]
        ).astype(o_ref.dtype)


def prepare_rnn_cell_params(wx_w, wx_b, wh_w, wh_b,
                            compute_dtype=jnp.bfloat16,
                            weight_dtype=None,
                            max_tile=2048):
    """One-time (init) prep: fuse, pre-transpose, optionally quantize, pad.

    wx_w: (H, I), wx_b: (H,)   -- PyTorch nn.Linear layout (y = x @ W.T + b)
    wh_w: (H, H), wh_b: (H,)

    weight_dtype:
      None     -> store the stacked weight in compute_dtype (bf16 / f32).
      jnp.int8 -> per-output-column symmetric int8 quantization; the per-column
                  scale is folded into the kernel's f32 epilogue.
    """
    wx_w = jnp.asarray(wx_w, jnp.float32)
    wx_b = jnp.asarray(wx_b, jnp.float32)
    wh_w = jnp.asarray(wh_w, jnp.float32)
    wh_b = jnp.asarray(wh_b, jnp.float32)

    H, I = wx_w.shape
    assert wh_w.shape == (H, H)

    quantize_int8 = (weight_dtype is not None
                     and jnp.dtype(weight_dtype) == jnp.dtype(jnp.int8))
    store_dtype = jnp.int8 if quantize_int8 else compute_dtype
    w_bytes = jnp.dtype(store_dtype).itemsize

    # --- tile selection (init-time; only depends on dims & dtypes) ----------
    tk = min(_pick_tile(I, max_tile), _pick_tile(H, max_tile))
    tn = _pick_tile(H, max_tile)

    # Keep the double-buffered weight blocks inside a conservative VMEM budget.
    while 2 * tk * tn * w_bytes > _WEIGHT_BLOCK_VMEM_CAP:
        if tk > _LANE:
            tk //= 2
        elif tn > _LANE:
            tn //= 2
        else:
            break

    Hp = _round_up(H, tn)
    # v7x shards the "parallel" (N) grid axis across its 2 TensorCores -- make
    # sure it has >= 2 blocks whenever the hidden dim allows it.
    if Hp // tn < 2 and tn > _LANE:
        tn //= 2

    Ip = _round_up(I, tk)        # x-region rows of the stacked weight
    Hh = _round_up(H, tk)        # h-region rows of the stacked weight
    Kp = Ip + Hh

    # --- stacked weight [Wx^T ; Wh^T], optional int8 quantization ------------
    w_cat = jnp.concatenate([wx_w.T, wh_w.T], axis=0)          # (I+H, H) f32
    if quantize_int8:
        absmax = jnp.max(jnp.abs(w_cat), axis=0, keepdims=True)  # (1, H)
        scale = jnp.maximum(absmax, 1e-8) / 127.0                 # (1, H) f32
        w_store = jnp.clip(jnp.round(w_cat / scale), -127, 127).astype(jnp.int8)
    else:
        scale = jnp.ones((1, H), jnp.float32)
        w_store = w_cat.astype(store_dtype)

    w_pad = jnp.zeros((Kp, Hp), store_dtype)
    w_pad = w_pad.at[:I, :H].set(w_store[:I])            # x region
    w_pad = w_pad.at[Ip:Ip + H, :H].set(w_store[I:])     # h region

    scale_pad = jnp.ones((1, Hp), jnp.float32).at[:, :H].set(scale)
    b_pad = jnp.zeros((1, Hp), jnp.float32).at[0, :H].set(wx_b + wh_b)

    return {
        "w": w_pad,              # (Kp, Hp) stacked weight
        "scale": scale_pad,      # (1, Hp)  per-output-column dequant scale
        "b": b_pad,              # (1, Hp)  fused bias bx + bh (f32)
        "input_size": I,
        "hidden_size": H,
        "Ip": Ip, "Hh": Hh, "Hp": Hp,
        "tk": tk, "tn": tn,
        "compute_dtype": compute_dtype,
    }


def rnn_cell(params, x, h=None):
    """x: (B, input_size); h: (B, H) / (1, H) / None (-> zeros, as in PyTorch).

    Returns (B, hidden_size) in x.dtype.
    """
    I, H = params["input_size"], params["hidden_size"]
    Ip, Hh, Hp = params["Ip"], params["Hh"], params["Hp"]
    tk, tn = params["tk"], params["tn"]
    cd = params["compute_dtype"]

    out_dtype = x.dtype
    B = x.shape[0]
    Bp = _round_up(B, _sublane_pack(cd))

    # Single fused pad per activation (no concat / zeros / .at[].set per call).
    zero = jnp.zeros((), cd)
    x_p = lax.pad(x.astype(cd), zero, ((0, Bp - B, 0), (0, Ip - I, 0)))
    if h is None:
        # PyTorch default: h = zeros([1, H]); its matmul contributes nothing.
        h_p = jnp.zeros((Bp, Hh), cd)
    else:
        h_b = jnp.broadcast_to(h, (B, H)).astype(cd)
        h_p = lax.pad(h_b, zero, ((0, Bp - B, 0), (0, Hh - H, 0)))

    n_kx = Ip // tk
    n_kh = Hh // tk
    grid = (Hp // tn, n_kx + n_kh)

    # VMEM budget: double-buffered pipeline blocks + f32 accumulator, with
    # headroom, capped below v7x's 64 MiB physical VMEM.
    ab = jnp.dtype(cd).itemsize
    wb = jnp.dtype(params["w"].dtype).itemsize
    ob = jnp.dtype(out_dtype).itemsize
    need = 2 * (2 * Bp * tk * ab        # x and h blocks
                + tk * tn * wb          # weight block
                + 2 * tn * 4            # scale + bias blocks
                + Bp * tn * ob)         # output block
    need += Bp * tn * 4                 # f32 accumulator scratch
    vmem_limit = int(min(max(need + (4 << 20), 16 << 20), _VMEM_LIMIT_CAP))

    kernel = functools.partial(_rnn_cell_kernel, n_kx=n_kx)

    out = pl.pallas_call(
        kernel,
        out_shape=jax.ShapeDtypeStruct((Bp, Hp), out_dtype),
        grid_spec=pltpu.PrefetchScalarGridSpec(
            num_scalar_prefetch=0,
            grid=grid,
            in_specs=[
                # x chunks walk k < n_kx, then clamp (no re-DMA afterwards).
                pl.BlockSpec((Bp, tk),
                             lambda n, k: (0, jnp.minimum(k, n_kx - 1))),
                # h chunks stay at 0 until k >= n_kx, then walk.
                pl.BlockSpec((Bp, tk),
                             lambda n, k: (0, jnp.maximum(k - n_kx, 0))),
                # stacked [Wx^T ; Wh^T] -- the only big HBM stream.
                pl.BlockSpec((tk, tn), lambda n, k: (k, n)),
                pl.BlockSpec((1, tn), lambda n, k: (0, n)),   # per-column scale
                pl.BlockSpec((1, tn), lambda n, k: (0, n)),   # fused bias
            ],
            out_specs=pl.BlockSpec((Bp, tn), lambda n, k: (0, n)),
            scratch_shapes=[pltpu.VMEM((Bp, tn), jnp.float32)],
        ),
        compiler_params=pltpu.CompilerParams(
            dimension_semantics=("parallel", "arbitrary"),
            vmem_limit_bytes=vmem_limit,
        ),
    )(x_p, h_p, params["w"], params["scale"], params["b"])

    # Padded rows/cols hold tanh(bias) garbage -- always slice before use.
    return out[:B, :H]


def _reference(x, wx_w, wx_b, wh_w, wh_b, h=None):
    H = wh_w.shape[0]
    if h is None:
        h = jnp.zeros((1, H), dtype=x.dtype)
    return jnp.tanh(x @ wx_w.T + wx_b + h @ wh_w.T + wh_b)


if __name__ == "__main__":
    batch = 2
    input_size = 16
    hidden_size = 32

    key = jax.random.PRNGKey(0)
    k1, k2, k3, k4, k5, k6 = jax.random.split(key, 6)

    # Deterministic init mimicking nn.Linear's U(-1/sqrt(fan_in), +1/sqrt(fan_in)).
    bx_bound = 1.0 / jnp.sqrt(jnp.float32(input_size))
    bh_bound = 1.0 / jnp.sqrt(jnp.float32(hidden_size))
    wx_w = jax.random.uniform(k1, (hidden_size, input_size), jnp.float32,
                              -bx_bound, bx_bound)
    wx_b = jax.random.uniform(k2, (hidden_size,), jnp.float32, -bx_bound, bx_bound)
    wh_w = jax.random.uniform(k3, (hidden_size, hidden_size), jnp.float32,
                              -bh_bound, bh_bound)
    wh_b = jax.random.uniform(k4, (hidden_size,), jnp.float32, -bh_bound, bh_bound)

    x = jax.random.normal(k5, (batch, input_size), jnp.float32)
    h_in = jax.random.normal(k6, (1, hidden_size), jnp.float32)

    ref0 = _reference(x, wx_w, wx_b, wh_w, wh_b, h=None)
    ref_h = _reference(x, wx_w, wx_b, wh_w, wh_b, h=h_in)

    # --- f32 path (tight tolerance), h=None default as in the module ---------
    p_f32 = prepare_rnn_cell_params(wx_w, wx_b, wh_w, wh_b,
                                    compute_dtype=jnp.float32)
    out = jax.block_until_ready(rnn_cell(p_f32, x, h=None))
    assert out.shape == (batch, hidden_size) and out.dtype == x.dtype
    assert jnp.allclose(out, ref0, atol=1e-5, rtol=1e-5), "f32 (h=None) mismatch"

    out = jax.block_until_ready(rnn_cell(p_f32, x, h=h_in))
    assert jnp.allclose(out, ref_h, atol=1e-5, rtol=1e-5), "f32 (h) mismatch"

    # --- bf16 weights/activations, f32 accumulation ---------------------------
    p_bf16 = prepare_rnn_cell_params(wx_w, wx_b, wh_w, wh_b,
                                     compute_dtype=jnp.bfloat16)
    out = jax.block_until_ready(rnn_cell(p_bf16, x, h=h_in))
    assert out.shape == (batch, hidden_size)
    assert jnp.allclose(out, ref_h, atol=2e-2, rtol=2e-2), "bf16 mismatch"

    # --- int8-quantized weight (per-column scales), bf16 acts, f32 accum ------
    p_i8 = prepare_rnn_cell_params(wx_w, wx_b, wh_w, wh_b,
                                   compute_dtype=jnp.bfloat16,
                                   weight_dtype=jnp.int8)
    out = jax.block_until_ready(rnn_cell(p_i8, x, h=h_in))
    assert out.shape == (batch, hidden_size)
    assert jnp.allclose(out, ref_h, atol=3e-2, rtol=3e-2), "int8 mismatch"

    print("KERNEL_OK")
</pallas_src>

<mosaic_0001>
module attributes {stable_mosaic.version = 11 : i64} {
  func.func @_rnn_cell_kernel(%arg0: i32, %arg1: i32, %arg2: memref<8x128xf32, #tpu.memory_space<vmem>>, %arg3: memref<8x128xf32, #tpu.memory_space<vmem>>, %arg4: memref<128x128xf32, #tpu.memory_space<vmem>>, %arg5: memref<1x128xf32, #tpu.memory_space<vmem>>, %arg6: memref<1x128xf32, #tpu.memory_space<vmem>>, %arg7: memref<8x128xf32, #tpu.memory_space<vmem>>, %arg8: memref<8x128xf32, #tpu.memory_space<vmem>>) attributes {dimension_semantics = [#tpu.dimension_semantics<parallel>, #tpu.dimension_semantics<arbitrary>], iteration_bounds = array<i64: 1, 2>, scalar_prefetch = 0 : i64, scratch_operands = 1 : i64, tpu.core_type = #tpu.core_type<tc>, window_params = [{transform_indices = @transform_0, window_bounds = array<i64: 8, 128>}, {transform_indices = @transform_1, window_bounds = array<i64: 8, 128>}, {transform_indices = @transform_2, window_bounds = array<i64: 128, 128>}, {transform_indices = @transform_3, window_bounds = array<i64: 1, 128>}, {transform_indices = @transform_4, window_bounds = array<i64: 1, 128>}, {transform_indices = @transform_5, window_bounds = array<i64: 8, 128>}]} {
    %c0_i32 = arith.constant 0 : i32
    %0 = arith.cmpi eq, %arg1, %c0_i32 : i32
    %1 = arith.extui %0 : i1 to i32
    %c0_i32_0 = arith.constant 0 : i32
    %2 = arith.cmpi ne, %1, %c0_i32_0 : i32
    scf.if %2 {
      %cst = arith.constant 0.000000e+00 : f32
      %13 = vector.broadcast %cst : f32 to vector<8x128xf32>
      %c0_7 = arith.constant 0 : index
      %c0_8 = arith.constant 0 : index
      %14 = vector.load %arg8[%c0_7, %c0_8] : memref<8x128xf32, #tpu.memory_space<vmem>>, vector<8x128xf32>
      tpu.vector_store %arg8[%c0_7, %c0_8], %13 {strides = array<i32>} : memref<8x128xf32, #tpu.memory_space<vmem>>, vector<8x128xf32>,
    } else {
    }
    %c0 = arith.constant 0 : index
    %c0_1 = arith.constant 0 : index
    %3 = vector.load %arg4[%c0, %c0_1] : memref<128x128xf32, #tpu.memory_space<vmem>>, vector<128x128xf32>
    %c1_i32 = arith.constant 1 : i32
    %4 = arith.cmpi slt, %arg1, %c1_i32 : i32
    %5 = arith.extui %4 : i1 to i32
    %c0_i32_2 = arith.constant 0 : i32
    %6 = arith.cmpi ne, %5, %c0_i32_2 : i32
    scf.if %6 {
      %c0_7 = arith.constant 0 : index
      %c0_8 = arith.constant 0 : index
      %13 = vector.load %arg8[%c0_7, %c0_8] : memref<8x128xf32, #tpu.memory_space<vmem>>, vector<8x128xf32>
      %c0_9 = arith.constant 0 : index
      %c0_10 = arith.constant 0 : index
      %14 = vector.load %arg2[%c0_9, %c0_10] : memref<8x128xf32, #tpu.memory_space<vmem>>, vector<8x128xf32>
      %cst = arith.constant dense<0.000000e+00> : vector<8x128xf32>
      %15 = tpu.matmul %14, %3, %cst {dimension_numbers = #tpu.dot_dimension_numbers<[1], [0], [0], [1], [0, 0, 1, 1], [], []>} : vector<8x128xf32>, vector<128x128xf32>, vector<8x128xf32> -> vector<8x128xf32>
      %16 = arith.addf %13, %15 : vector<8x128xf32>
      %c0_11 = arith.constant 0 : index
      %c0_12 = arith.constant 0 : index
      %17 = vector.load %arg8[%c0_11, %c0_12] : memref<8x128xf32, #tpu.memory_space<vmem>>, vector<8x128xf32>
      tpu.vector_store %arg8[%c0_11, %c0_12], %16 {strides = array<i32>} : memref<8x128xf32, #tpu.memory_space<vmem>>, vector<8x128xf32>,
    } else {
    }
    %c1_i32_3 = arith.constant 1 : i32
    %7 = arith.cmpi sge, %arg1, %c1_i32_3 : i32
    %8 = arith.extui %7 : i1 to i32
    %c0_i32_4 = arith.constant 0 : i32
    %9 = arith.cmpi ne, %8, %c0_i32_4 : i32
    scf.if %9 {
      %c0_7 = arith.constant 0 : index
      %c0_8 = arith.constant 0 : index
      %13 = vector.load %arg8[%c0_7, %c0_8] : memref<8x128xf32, #tpu.memory_space<vmem>>, vector<8x128xf32>
      %c0_9 = arith.constant 0 : index
      %c0_10 = arith.constant 0 : index
      %14 = vector.load %arg3[%c0_9, %c0_10] : memref<8x128xf32, #tpu.memory_space<vmem>>, vector<8x128xf32>
      %cst = arith.constant dense<0.000000e+00> : vector<8x128xf32>
      %15 = tpu.matmul %14, %3, %cst {dimension_numbers = #tpu.dot_dimension_numbers<[1], [0], [0], [1], [0, 0, 1, 1], [], []>} : vector<8x128xf32>, vector<128x128xf32>, vector<8x128xf32> -> vector<8x128xf32>
      %16 = arith.addf %13, %15 : vector<8x128xf32>
      %c0_11 = arith.constant 0 : index
      %c0_12 = arith.constant 0 : index
      %17 = vector.load %arg8[%c0_11, %c0_12] : memref<8x128xf32, #tpu.memory_space<vmem>>, vector<8x128xf32>
      tpu.vector_store %arg8[%c0_11, %c0_12], %16 {strides = array<i32>} : memref<8x128xf32, #tpu.memory_space<vmem>>, vector<8x128xf32>,
    } else {
    }
    %c1_i32_5 = arith.constant 1 : i32
    %10 = arith.cmpi eq, %arg1, %c1_i32_5 : i32
    %11 = arith.extui %10 : i1 to i32
    %c0_i32_6 = arith.constant 0 : i32
    %12 = arith.cmpi ne, %11, %c0_i32_6 : i32
    scf.if %12 {
      %c0_7 = arith.constant 0 : index
      %c0_8 = arith.constant 0 : index
      %13 = vector.load %arg8[%c0_7, %c0_8] : memref<8x128xf32, #tpu.memory_space<vmem>>, vector<8x128xf32>
      %c0_9 = arith.constant 0 : index
      %c0_10 = arith.constant 0 : index
      %14 = vector.load %arg5[%c0_9, %c0_10] : memref<1x128xf32, #tpu.memory_space<vmem>>, vector<1x128xf32>
      %15 = vector.broadcast %14 : vector<1x128xf32> to vector<8x128xf32>
      %16 = arith.mulf %13, %15 : vector<8x128xf32>
      %c0_11 = arith.constant 0 : index
      %c0_12 = arith.constant 0 : index
      %17 = vector.load %arg6[%c0_11, %c0_12] : memref<1x128xf32, #tpu.memory_space<vmem>>, vector<1x128xf32>
      %18 = vector.broadcast %17 : vector<1x128xf32> to vector<8x128xf32>
      %19 = arith.addf %16, %18 : vector<8x128xf32>
      %20 = math.tanh %19 : vector<8x128xf32>
      %c0_13 = arith.constant 0 : index
      %c0_14 = arith.constant 0 : index
      %21 = vector.load %arg7[%c0_13, %c0_14] : memref<8x128xf32, #tpu.memory_space<vmem>>, vector<8x128xf32>
      tpu.vector_store %arg7[%c0_13, %c0_14], %20 {strides = array<i32>} : memref<8x128xf32, #tpu.memory_space<vmem>>, vector<8x128xf32>,
    } else {
    }
    return
  }
  func.func @transform_0(%arg0: i32, %arg1: i32) -> (i32, i32) {
    %c0_i32 = arith.constant 0 : i32
    %0 = arith.minsi %arg1, %c0_i32 : i32
    %c0_i32_0 = arith.constant 0 : i32
    %c0_i32_1 = arith.constant 0 : i32
    return %c0_i32_0, %0 : i32, i32
  }
  func.func @transform_1(%arg0: i32, %arg1: i32) -> (i32, i32) {
    %c1_i32 = arith.constant 1 : i32
    %0 = arith.subi %arg1, %c1_i32 : i32
    %c0_i32 = arith.constant 0 : i32
    %1 = arith.maxsi %0, %c0_i32 : i32
    %c0_i32_0 = arith.constant 0 : i32
    %c0_i32_1 = arith.constant 0 : i32
    return %c0_i32_0, %1 : i32, i32
  }
  func.func @transform_2(%arg0: i32, %arg1: i32) -> (i32, i32) {
    %c0_i32 = arith.constant 0 : i32
    return %arg1, %arg0 : i32, i32
  }
  func.func @transform_3(%arg0: i32, %arg1: i32) -> (i32, i32) {
    %c0_i32 = arith.constant 0 : i32
    %c0_i32_0 = arith.constant 0 : i32
    return %c0_i32, %arg0 : i32, i32
  }
  func.func @transform_4(%arg0: i32, %arg1: i32) -> (i32, i32) {
    %c0_i32 = arith.constant 0 : i32
    %c0_i32_0 = arith.constant 0 : i32
    return %c0_i32, %arg0 : i32, i32
  }
  func.func @transform_5(%arg0: i32, %arg1: i32) -> (i32, i32) {
    %c0_i32 = arith.constant 0 : i32
    %c0_i32_0 = arith.constant 0 : i32
    return %c0_i32, %arg0 : i32, i32
  }
}

</mosaic_0001>

<bundles_post_ra>
// kernel: tpu_custom_call.1
= control target key start
LH: loop header
LB: loop body
LE: loop exit
PB: predicated region body
PF: predicated region fallthrough
CT: control target
= control target key end

     0   :  { %s1625_s0 = inlined_call_operand.hbm [shape: f32[8,128], index: 0, kind: input, shape index: {}]   ;;  %s1626_s1 = inlined_call_operand.hbm [shape: f32[8,128], index: 1, kind: input, shape index: {}]   ;;  %s1627_s2 = inlined_call_operand.hbm [shape: f32[256,128], index: 2, kind: input, shape index: {}]   ;;  %s1628_s3 = inlined_call_operand.vmem [shape: f32[1,128], index: 3, kind: input, shape index: {}]   ;;  %s1629_s4 = inlined_call_operand.vmem [shape: f32[1,128], index: 4, kind: input, shape index: {}]   ;;  %s1630_s5 = inlined_call_operand.hbm [shape: f32[8,128], index: 5, kind: output, shape index: {}]  }
   0x1   :  { %1641 = sst [smem:[#allocation15_spill]] %s1626_s1 }
   0x2   :  { %10 = vsyncpa [#allocation4], 0 }
   0x3   :  { %12 = vsyncpa [#allocation4 + $0x1], 0 }
   0x4   :  { %13 = vsyncpa [#allocation7], 0 }
   0x5   :  { %15 = vsyncpa [#allocation7 + $0x1], 0 }
   0x6   :  { %16 = vsyncpa [#allocation5], 0  ;;  %s1288_s18 = smov 0   ;;  %s1290_s19 = smov 0  }
   0x7   :  { %s1292_s20 = smov 0   ;;  %s1294_s21 = smov 0  }
   0x8   :  { %s1296_s22 = smov 0   ;;  %s1298_s23 = smov 0  }
   0x9   :  { %s1300_s24 = smov 0   ;;  %s1302_s25 = smov 0  }
   0xa   :  { %s1304_s26 = smov 0   ;;  %s1306_s27 = smov 0  }
   0xb LB: > { %s1335_s28 = sadd.s32 4294967295, %s1243_s27   ;;  %s31_s29 = sadd.s32 1, %s1239_s26  ;;  %s1243_s27 = sphi %s1306_s27, %s22_s27   ;;  %s1239_s26 = sphi %s1304_s26, %s1670_s26   ;;  %s1235_s25 = sphi %s1302_s25, %s1669_s25   ;;  %s1231_s24 = sphi %s1300_s24, %s1615_s24   ;;  %s1227_s23 = sphi %s1298_s23, %s1668_s23   ;;  %s1223_s22 = sphi %s1296_s22, %s1610_s22   ;;  %s1219_s21 = sphi %s1294_s21, %s1667_s21   ;;  %s1215_s20 = sphi %s1292_s20, %s1666_s20   ;;  %s1211_s19 = sphi %s1290_s19, %s1665_s19   ;;  %s1207_s18 = sphi %s1288_s18, %s1664_s18  }
   0xc   : > { %p32_p0 = scmp.ge.s32.totalorder %s31_s29, 2  ;;  %p1633_p1 = scmp.eq.s32.totalorder %s1243_s27, 0 }
   0xd   : > { %p1632_p2 = scmp.eq.s32.totalorder %s1335_s28, 0  ;;  %p1203_p3 = scmp.ne.s32.totalorder %s1223_s22, 0 }
   0xe   : > { %s1672_s29 = smov (%p32_p0, %s31_s29), 0  ;;  %p90_p5 = scmp.ne.s32.totalorder %s1223_s22, %s1219_s21 }
   0xf   : > { %1642 = sst [smem:[#allocation14_spill]] %s1672_s29  ;;  %p1345_p4 = por %p1203_p3, %p1633_p1 }
  0x10   : > { %s100_s6 = ssub.s32 %s1239_s26, %s1672_s29  ;;  %p1354_p6 = por %p90_p5, %p1632_p2 }
  0x11   : > { %p103_p7 = scmp.eq.s32.totalorder %s100_s6, 0  ;;  %s105_s8 = sadd.s32 1, %s1215_s20 }
  0x12   : > { %s1644_s7 = scalar_select %p1354_p6, 1, 0 }
  0x13   : > { %p112_p8 = scmp.ne.s32.totalorder %s1215_s20, %s1211_s19  ;;  %p118_p10 = scmp.ne.s32.totalorder %s1211_s19, %s1207_s18 }
  0x14   : > { %s1362_s9 = scalar_select %p103_p7, %s1215_s20, %s105_s8  }
  0x15   : > { %p114_p9 = por %p112_p8, %p1633_p1  ;;  %p1631_p11 = scmp.lt.s32.totalorder %s1243_s27, 2 }
  0x16   : > { %p1370_p12 = por %p118_p10, %p1632_p2  ;;  %s252_s11 = sand.u32 1, %s1243_s27  }
  0x17   : > { %s1245_s12 = smov [#allocation6]   ;;  %p1379_p13 = pnand %p1631_p11, %p1345_p4 }
  0x18   : > { %s1645_s10 = scalar_select %p1370_p12, 1, 0 }
  0x19   : > { %s266_s13 = sshll.u32 %s1245_s12, 4  ;;  %p1385_p0 = pnand %p1631_p11, %p114_p9  ;;  %s267_s13 = int_to_ptr.vmem [resolvable:$true] %s266_s13 }
  0x1a   : > { %s1646_s14 = scalar_select %p1379_p13, 1, 0 }
  0x1b   : > { %s1647_s15 = scalar_select %p1385_p0, 1, 0 }
  0x1c   : > { %s1390_s16 = scalar_lea.sflag [#allocation7], %s252_s11  ;;  %s1648_s1 = sld [smem:[#allocation15_spill]] }
  0x1d   : > { %p1025_p5 = pneg %p1379_p13 }
  0x22   : > { %s1023_s21 = scalar_lea.hbm %s1648_s1, 128 }
  0x23   : > { %p1024_p4 = scmp.ne.s32.totalorder %s1648_s1, %s1023_s21  ;;  %p1030_p10 = scmp.lt.u32.totalorder %s1023_s21, %s1023_s21 }
  0x24   : > { %p1032_p9 = scmp.lt.u32.totalorder %s1023_s21, %s1648_s1 }
  0x25   : > { %p1026_p7 = pnand %p1025_p5, %p1024_p4 }
  0x26   : > { %p1033_p11 = por %p1032_p9, %p1030_p10 }
  0x27   : > { %p1027_p8 = pneg %p1026_p7 }
  0x29   : > { %p1034_p2 = pnand %p1033_p11, %p1027_p8 }
  0x2b   : > { %1037 = shalt.err (!%p1034_p2)
}
  0x2c   : > { %s1038_s11 = scalar_lea.vmem %s267_s13, 128  ;;  %s1045_s17 = scalar_lea.vmem %s267_s13, 256 }
  0x2d   : > { %p1039_p1 = scmp.ne.s32.totalorder %s267_s13, %s1038_s11  ;;  %p1046_p6 = scmp.lt.s32.totalorder %s267_s13, %s267_s13 }
  0x2e   : > { %p1047_p0 = scmp.lt.s32.totalorder %s1045_s17, %s1038_s11 }
  0x2f   : > { %p1041_p3 = pnand %p1039_p1, %p1025_p5 }
  0x30   : > { %p1048_p13 = por %p1047_p0, %p1046_p6 }
  0x31   : > { %p1042_p12 = pneg %p1041_p3 }
  0x33   : > { %p1049_p4 = pnand %p1048_p13, %p1042_p12 }
  0x35   : > { %1052 = shalt.err (!%p1049_p4)
}
  0x36   : > { %p1649_p7 = scmp.ne.s32.totalorder %s1646_s14, 0  ;;  %p293_p1 = scmp.lt.s32.totalorder %s1243_s27, 3 }
  0x37   : > { %p1650_p2 = scmp.ge.s32.totalorder %s1243_s27, 1  ;;  %p1204_p11 = scmp.ne.s32.totalorder %s1231_s24, 0 }
  0x38   : > { %908 = dma.hbm_to_vmem [thread:$0]  (!%p1649_p7), %s1648_s1, 128, %s267_s13, %s1390_s16  }
  0x39   : > { %p1412_p6 = pnand %p1650_p2, %p293_p1  ;;  %p58_p12 = scmp.ne.s32.totalorder %s1231_s24, %s1227_s23 }
  0x3a   : > { %p1652_p13 = scmp.eq.s32.totalorder %s1243_s27, 0  ;;  %p1653_p3 = scmp.eq.s32.totalorder %s1335_s28, 0 }
  0x3b   : > { %s1651_s21 = scalar_select %p1412_p6, 1, 0 }
  0x3c   : > { %p54_p0 = por %p1204_p11, %p1652_p13  ;;  %p1423_p5 = por %p1653_p3, %p58_p12 }
  0x3d   : > { %s1246_s6 = smov [#allocation3]   ;;  %p1655_p8 = scmp.lt.s32.totalorder %s1243_s27, 2 }
  0x3e   : > { %s1654_s14 = scalar_select %p1423_p5, 1, 0 }
  0x3f   : > { %s245_s8 = sshll.u32 %s1246_s6, 4  ;;  %p1429_p10 = pnand %p1655_p8, %p54_p0  ;;  %s246_s8 = int_to_ptr.vmem [resolvable:$true] %s245_s8 }
  0x40   : > { %s275_s12 = sand.u32 1, %s1215_s20   ;;  %s1053_s18 = scalar_lea.hbm %s1625_s0, 128 }
  0x41   : > { %s1656_s13 = scalar_select %p1429_p10, 1, 0 }
  0x42   : > { %s722_s11 = sshll.u32 %s275_s12, 7  ;;  %p1054_p9 = scmp.ne.s32.totalorder %s1625_s0, %s1053_s18 }
  0x43   : > { %p1055_p4 = pneg %p1429_p10  ;;  %p1060_p2 = scmp.lt.u32.totalorder %s1053_s18, %s1053_s18 }
  0x44   : > { %p1062_p11 = scmp.lt.u32.totalorder %s1053_s18, %s1625_s0 }
  0x45   : > { %p1056_p7 = pnand %p1055_p4, %p1054_p9 }
  0x46   : > { %p1063_p12 = por %p1062_p11, %p1060_p2 }
  0x47   : > { %p1057_p1 = pneg %p1056_p7 }
  0x49   : > { %p1064_p13 = pnand %p1063_p12, %p1057_p1 }
  0x4b   : > { %1067 = shalt.err (!%p1064_p13)
}
  0x4c   : > { %s1068_s12 = scalar_lea.vmem %s246_s8, 128  ;;  %s1075_s17 = scalar_lea.vmem %s246_s8, 256 }
  0x4d   : > { %p1069_p0 = scmp.ne.s32.totalorder %s246_s8, %s1068_s12  ;;  %p1076_p5 = scmp.lt.s32.totalorder %s246_s8, %s246_s8 }
  0x4e   : > { %p1077_p6 = scmp.lt.s32.totalorder %s1075_s17, %s1068_s12 }
  0x4f   : > { %p1071_p3 = pnand %p1069_p0, %p1055_p4 }
  0x50   : > { %p1078_p10 = por %p1077_p6, %p1076_p5 }
  0x51   : > { %p1072_p8 = pneg %p1071_p3 }
  0x53   : > { %p1079_p9 = pnand %p1078_p10, %p1072_p8 }
  0x55   : > { %1082 = shalt.err (!%p1079_p9)
}
  0x56   : > { %p1657_p7 = scmp.ne.s32.totalorder %s1656_s13, 0  ;;  %s739_s29 = sshll.u32 %s1239_s26, 11 }
  0x57   : > { %s1454_s6 = scalar_lea.hbm %s1627_s2, %s739_s29  ;;  %s277_s12 = scalar_lea.vmem [#allocation8], %s722_s11 }
  0x58   : > { %905 = dma.hbm_to_vmem [thread:$0]  (!%p1657_p7), %s1625_s0, 128, %s246_s8, [#allocation4]  }
  0x59   : > { %s285_s17 = sshll.u32 %s277_s12, 4  ;;  %s1083_s13 = scalar_lea.hbm %s1454_s6, 2048  ;;  %s1456_s17 = int_to_ptr.vmem [resolvable:$true] %s285_s17 }
  0x5a   : > { %p1084_p6 = scmp.ne.s32.totalorder %s1454_s6, %s1083_s13  ;;  %p1658_p5 = scmp.ne.s32.totalorder %s1647_s15, 0 }
  0x5b   : > { %s1088_s23 = scalar_lea.hbm %s1627_s2, 4096  ;;  %p1089_p2 = scmp.lt.u32.totalorder %s1454_s6, %s1627_s2 }
  0x5c   : > { %p1085_p10 = pneg %p1658_p5  ;;  %p1090_p11 = scmp.lt.u32.totalorder %s1088_s23, %s1083_s13 }
  0x5d   : > { %p1092_p13 = scmp.lt.u32.totalorder %s1083_s13, %s1454_s6 }
  0x5e   : > { %p1086_p4 = pnand %p1085_p10, %p1084_p6  ;;  %p1091_p12 = por %p1090_p11, %p1089_p2 }
  0x60   : > { %p1087_p1 = pneg %p1086_p4  ;;  %p1093_p0 = por %p1092_p13, %p1091_p12 }
  0x62   : > { %p1094_p3 = pnand %p1093_p0, %p1087_p1 }
  0x64   : > { %1097 = shalt.err (!%p1094_p3)
}
  0x65   : > { %s1098_s11 = scalar_lea.vmem %s1456_s17, 2048  ;;  %s1247_s30 = smov [#allocation8]  }
  0x66   : > { %p1099_p8 = scmp.ne.s32.totalorder %s1456_s17, %s1098_s11  ;;  %s1103_s12 = sshll.u32 %s1247_s30, 4  ;;  %s1104_s12 = int_to_ptr.vmem [resolvable:$false] %s1103_s12 }
  0x67   : > { %s1105_s8 = scalar_lea.vmem %s1104_s12, 4096  ;;  %p1106_p6 = scmp.lt.s32.totalorder %s1456_s17, %s1104_s12 }
  0x68   : > { %p1101_p9 = pnand %p1099_p8, %p1085_p10  ;;  %p1107_p4 = scmp.lt.s32.totalorder %s1105_s8, %s1098_s11 }
  0x6a   : > { %p1102_p7 = pneg %p1101_p9  ;;  %p1108_p2 = por %p1107_p4, %p1106_p6 }
  0x6c   : > { %p1109_p11 = pnand %p1108_p2, %p1102_p7 }
  0x6e   : > { %1112 = shalt.err (!%p1109_p11)
}
  0x6f   : > { %s1248_s13 = smov 128   ;;  %s1249_s1 = smov 8  }
  0x70   : > { %911 = dma.hbm_to_vmem [thread:$0]  (!%p1658_p5), %s1454_s6, 2048, %s1456_s17, %s1390_s16, %s1248_s13, %s1248_s13, %s1249_s1  }
  0x71   : > { %p1659_p10 = scmp.ne.s32.totalorder %s1651_s21, 0 }
  0x72   : > { %s299_s23 = sand.u32 (!%p1659_p10), 1, %s1231_s24   ;;  %p1660_p1 = scmp.ne.s32.totalorder (!%p1659_p10), %s1654_s14, 0 }
  0x73   : > { %297 = sbr.rel (%p1659_p10) target bundleno = 687 (0x2af), region = 40  ;;  %s1487_s29 = sshll.u32 (!%p1659_p10), %s299_s23, 3 }
  0x74   : > { %s300_s18 = scalar_lea.sflag (!%p1659_p10), [#allocation4], %s299_s23  ;;  %s303_s11 = scalar_lea.vmem (!%p1659_p10), [#allocation3], %s1487_s29 }
  0x7a   : > { %1188 = dma.done.wait (%p1660_p1), %s300_s18, 128  }
  0x7b   : > { %1190 = vsyncadd (%p1660_p1), %s300_s18, 4294967168  ;;  %s308_s15 = sand.u32 1, %s1335_s28   ;;  %s310_s16 = sand.u32 1, %s1223_s22  }
  0x7c   : > { %s1496_s21 = sshll.u32 %s310_s16, 3  ;;  %s309_s6 = scalar_lea.sflag [#allocation7], %s308_s15 }
  0x7d   : > { %s312_s17 = scalar_lea.vmem [#allocation6], %s1496_s21  ;;  %p1661_p5 = scmp.ne.s32.totalorder %s1644_s7, 0 }
  0x7f   : > { %1192 = dma.done.wait (%p1661_p5), %s309_s6, 128  }
  0x80   : > { %1194 = vsyncadd (%p1661_p5), %s309_s6, 4294967168  ;;  %s319_s30 = sand.u32 1, %s1211_s19   ;;  %p1662_p12 = scmp.ne.s32.totalorder %s1645_s10, 0 }
  0x81   : > { %s728_s14 = sshll.u32 %s319_s30, 7 }
  0x82   : > { %s321_s12 = scalar_lea.vmem [#allocation8], %s728_s14 }
  0x83   : > { %1196 = dma.done.wait (%p1662_p12), %s309_s6, 2048  }
  0x84   : > { %1198 = vsyncadd (%p1662_p12), %s309_s6, 4294965248  ;;  %p729_p13 = scmp.ne.s32.totalorder %s1235_s25, 0 }
  0x85   : > { %v1250_v0 = vmov (!%p729_p13), 0.0  }
  0x86   : > { %374 = sbr.rel (%p729_p13) target bundleno = 141 (0x8d), region = 56  ;;  %375 = vst [vmem:[#allocation2] sm:$0xff] (!%p729_p13), %v1250_v0 }
  0x8d PF: > { %v376_v1 = vld [vmem:[%s321_s12] sm:$0xff]  ;;  %v377_v2 = vld [vmem:[%s321_s12 + $0x8] sm:$0xff]  ;;  %v1509_v3 = vld [vmem:[%s321_s12 + $0x10] sm:$0xff]  ;;  %p730_p0 = scmp.ge.s32.totalorder %s1235_s25, 1 }
  0x8e   : > { %v379_v4 = vld [vmem:[%s321_s12 + $0x18] sm:$0xff]  ;;  %v1511_v5 = vld [vmem:[%s321_s12 + $0x20] sm:$0xff]  ;;  %v1513_v6 = vld [vmem:[%s321_s12 + $0x28] sm:$0xff]  ;;  %v845_v17 = vpack.c.bf16 (!%p730_p0), %v377_v2, %v376_v1  ;;  %v1251_v18 = vmov (!%p730_p0), 0.0|0.0   ;;  %vm1252_vm0 = vmmov (!%p730_p0), 0   ;;  %v1253_v20 = vmov (!%p730_p0), 0.0  }
  0x8f   : > { %v1515_v7 = vld [vmem:[%s321_s12 + $0x30] sm:$0xff]  ;;  %v1517_v8 = vld [vmem:[%s321_s12 + $0x38] sm:$0xff]  ;;  %v1519_v9 = vld [vmem:[%s321_s12 + $0x40] sm:$0xff]  ;;  %395 = sbr.rel (%p730_p0) target bundleno = 390 (0x186), region = 60  ;;  %844 = vmatprep.subr.bf16.mxu0 (!%p730_p0), %v1251_v18  ;;  %v848_v19 = vpack.c.bf16 (!%p730_p0), %v379_v4, %v1509_v3  ;;  %806 = vmatprep.mubr.msk.f32.mxu0 (!%p730_p0), %vm1252_vm0, %v1253_v20  ;;  %v851_v21 = vpack.c.bf16 (!%p730_p0), %v1513_v6, %v1511_v5 }
  0x90   : > { %v1521_v10 = vld [vmem:[%s321_s12 + $0x48] sm:$0xff]  ;;  %v1523_v11 = vld [vmem:[%s321_s12 + $0x50] sm:$0xff]  ;;  %v1525_v12 = vld [vmem:[%s321_s12 + $0x58] sm:$0xff]  ;;  %846 = vmatpush3.bf16.msra.mxu0 (!%p730_p0), %v845_v17  ;;  %v854_v22 = vpack.c.bf16 (!%p730_p0), %v1517_v8, %v1515_v7 }
  0x91   : > { %v1527_v13 = vld [vmem:[%s321_s12 + $0x60] sm:$0xff]  ;;  %v1529_v14 = vld [vmem:[%s321_s12 + $0x68] sm:$0xff]  ;;  %v1531_v15 = vld [vmem:[%s321_s12 + $0x70] sm:$0xff]  ;;  %847 = vmatprep.subr.bf16.mxu0 (!%p730_p0), %v1251_v18  ;;  %v857_v23 = vpack.c.bf16 (!%p730_p0), %v1521_v10, %v1519_v9  ;;  %v860_v24 = vpack.c.bf16 (!%p730_p0), %v1525_v12, %v1523_v11 }
  0x92   : > { %v1533_v16 = vld [vmem:[%s321_s12 + $0x78] sm:$0xff]  ;;  %v863_v25 = vpack.c.bf16 (!%p730_p0), %v1529_v14, %v1527_v13  ;;  %v397_v27 = vld [vmem:[%s303_s11] sm:$0xff] (!%p730_p0) }
  0x93   : > { %v866_v26 = vpack.c.bf16 (!%p730_p0), %v1533_v16, %v1531_v15  ;;  %v396_v28 = vld [vmem:[#allocation2] sm:$0xff] (!%p730_p0) }
  0x94   : > { %849 = vmatpush3.bf16.msra.mxu0 (!%p730_p0), %v848_v19 }
  0x95   : > { %850 = vmatprep.subr.bf16.mxu0 (!%p730_p0), %v1251_v18 }
  0x98   : > { %852 = vmatpush3.bf16.msra.mxu0 %v851_v21 }
  0x99   : > { %853 = vmatprep.subr.bf16.mxu0 %v1251_v18 }
  0x9c   : > { %855 = vmatpush3.bf16.msra.mxu0 %v854_v22 }
  0x9d   : > { %856 = vmatprep.subr.bf16.mxu0 %v1251_v18 }
  0xa0   : > { %858 = vmatpush3.bf16.msra.mxu0 %v857_v23 }
  0xa1   : > { %859 = vmatprep.subr.bf16.mxu0 %v1251_v18 }
  0xa4   : > { %861 = vmatpush3.bf16.msra.mxu0 %v860_v24 }
  0xa5   : > { %862 = vmatprep.subr.bf16.mxu0 %v1251_v18 }
  0xa8   : > { %864 = vmatpush3.bf16.msra.mxu0 %v863_v25 }
  0xa9   : > { %865 = vmatprep.subr.bf16.mxu0 %v1251_v18 }
  0xac   : > { %867 = vmatpush3.bf16.msra.mxu0 %v866_v26 }
  0xaf   : > { %807 = vmatmul.mubr.f32.vlgmr.msra.gmra.mrb[0].mxu0 %v397_v27 }
 0x182   : > { %v464_v29 = vpop.f32.mrb[0].mxu0 }
 0x183   : > { %v468_v30 = vadd.f32 %v464_v29, %v396_v28  ;;  %v808_v31 = vpop.f32.mrb[1].mxu0 }
 0x185   : > { %469 = vst [vmem:[#allocation2] sm:$0xff] %v468_v30 }
 0x186 PF: > { %p731_p3 = scmp.lt.s32.totalorder %s1235_s25, 1 }
 0x187   : > { %v869_v32 = vpack.c.bf16 (!%p731_p3), %v377_v2, %v376_v1  ;;  %v1254_v33 = vmov (!%p731_p3), 0.0|0.0   ;;  %v872_v34 = vpack.c.bf16 (!%p731_p3), %v379_v4, %v1509_v3  ;;  %vm1255_vm1 = vmmov (!%p731_p3), 0   ;;  %v475_v42 = vld [vmem:[%s312_s17] sm:$0xff] (!%p731_p3) }
 0x188   : > { %473 = sbr.rel (%p731_p3) target bundleno = 639 (0x27f), region = 64  ;;  %868 = vmatprep.subr.bf16.mxu0 (!%p731_p3), %v1254_v33  ;;  %v1256_v35 = vmov (!%p731_p3), 0.0   ;;  %v875_v36 = vpack.c.bf16 (!%p731_p3), %v1513_v6, %v1511_v5  ;;  %v878_v37 = vpack.c.bf16 (!%p731_p3), %v1517_v8, %v1515_v7  ;;  %v881_v38 = vpack.c.bf16 (!%p731_p3), %v1521_v10, %v1519_v9 }
 0x189   : > { %870 = vmatpush3.bf16.msra.mxu0 (!%p731_p3), %v869_v32  ;;  %841 = vmatprep.mubr.msk.f32.mxu0 (!%p731_p3), %vm1255_vm1, %v1256_v35  ;;  %v884_v39 = vpack.c.bf16 (!%p731_p3), %v1525_v12, %v1523_v11  ;;  %v887_v40 = vpack.c.bf16 (!%p731_p3), %v1529_v14, %v1527_v13  ;;  %v890_v41 = vpack.c.bf16 (!%p731_p3), %v1533_v16, %v1531_v15 }
 0x18a   : > { %871 = vmatprep.subr.bf16.mxu0 (!%p731_p3), %v1254_v33 }
 0x18c   : > { %v474_v43 = vld [vmem:[#allocation2] sm:$0xff] (!%p731_p3) }
 0x18d   : > { %873 = vmatpush3.bf16.msra.mxu0 (!%p731_p3), %v872_v34 }
 0x18e   : > { %874 = vmatprep.subr.bf16.mxu0 (!%p731_p3), %v1254_v33 }
 0x191   : > { %876 = vmatpush3.bf16.msra.mxu0 %v875_v36 }
 0x192   : > { %877 = vmatprep.subr.bf16.mxu0 %v1254_v33 }
 0x195   : > { %879 = vmatpush3.bf16.msra.mxu0 %v878_v37 }
 0x196   : > { %880 = vmatprep.subr.bf16.mxu0 %v1254_v33 }
 0x199   : > { %882 = vmatpush3.bf16.msra.mxu0 %v881_v38 }
 0x19a   : > { %883 = vmatprep.subr.bf16.mxu0 %v1254_v33 }
 0x19d   : > { %885 = vmatpush3.bf16.msra.mxu0 %v884_v39 }
 0x19e   : > { %886 = vmatprep.subr.bf16.mxu0 %v1254_v33 }
 0x1a1   : > { %888 = vmatpush3.bf16.msra.mxu0 %v887_v40 }
 0x1a2   : > { %889 = vmatprep.subr.bf16.mxu0 %v1254_v33 }
 0x1a5   : > { %891 = vmatpush3.bf16.msra.mxu0 %v890_v41 }
 0x1a8   : > { %842 = vmatmul.mubr.f32.vlgmr.msra.gmra.mrb[0].mxu0 %v475_v42 }
 0x27b   : > { %v542_v44 = vpop.f32.mrb[0].mxu0 }
 0x27c   : > { %v546_v45 = vadd.f32 %v542_v44, %v474_v43  ;;  %v843_v46 = vpop.f32.mrb[1].mxu0 }
 0x27e   : > { %547 = vst [vmem:[#allocation2] sm:$0xff] %v546_v45 }
 0x27f PF: > { %p732_p8 = scmp.ne.s32.totalorder %s1235_s25, 1 }
 0x280   : > { %v733_v48 = vld [vmem:[%s1628_s3] ss:$0 sm:$0xff] (!%p732_p8) }
 0x281   : > { %551 = sbr.rel (%p732_p8) target bundleno = 662 (0x296), region = 68  ;;  %v734_v49 = vld [vmem:[%s1629_s4] ss:$0 sm:$0xff] (!%p732_p8) }
 0x285   : > { %v552_v47 = vld [vmem:[#allocation2] sm:$0xff] (!%p732_p8) }
 0x286   : > { %v560_v50 = vmul.f32 (!%p732_p8), %v733_v48, %v552_v47 }
 0x288   : > { %v568_v51 = vadd.f32 %v734_v49, %v560_v50 }
 0x28a   : > { %1021 = vtanh.f32 %v568_v51 }
 0x294   : > { %v1022_v52 = vpop.eup %1021 }
 0x295   : > { %570 = vst [vmem:[#allocation9] sm:$0xff] %v1022_v52 }
 0x296 PF: > { %p913_p9 = scmp.eq.s32.totalorder %s1335_s28, 1  ;;  %s1257_s25 = smov [#allocation9]  }
 0x297   : > { %s580_s1 = sshll.u32 %s1257_s25, 4  ;;  %s581_s1 = int_to_ptr.vmem [resolvable:$true] %s580_s1 }
 0x298   : > { %s1113_s23 = scalar_lea.vmem %s581_s1, 128  ;;  %p1120_p2 = scmp.lt.s32.totalorder %s581_s1, %s581_s1 }
 0x299   : > { %p1114_p7 = scmp.ne.s32.totalorder %s581_s1, %s1113_s23  ;;  %p1121_p11 = scmp.lt.s32.totalorder %s1113_s23, %s1113_s23 }
 0x29b   : > { %p1115_p6 = pnand %p1114_p7, %p913_p9  ;;  %p1122_p10 = por %p1121_p11, %p1120_p2 }
 0x29d   : > { %p1116_p4 = pneg %p1115_p6 }
 0x29f   : > { %p1123_p1 = pnand %p1122_p10, %p1116_p4 }
 0x2a1   : > { %1126 = shalt.err (!%p1123_p1)
}
 0x2a2   : > { %s1127_s11 = scalar_lea.hbm %s1630_s5, 128 }
 0x2a3   : > { %p1128_p5 = scmp.ne.s32.totalorder %s1630_s5, %s1127_s11  ;;  %p1133_p0 = scmp.lt.u32.totalorder %s1127_s11, %s1630_s5 }
 0x2a5   : > { %p1129_p12 = pnand %p1128_p5, %p913_p9 }
 0x2a7   : > { %p1130_p13 = pneg %p1129_p12 }
 0x2a9   : > { %p1135_p3 = pnand %p1133_p0, %p1130_p13 }
 0x2ab   : > { %1138 = shalt.err (!%p1135_p3)
}
 0x2ac   : > { %899 = dma.vmem_to_hbm [thread:$0]  (%p913_p9), %s581_s1, 128, %s1630_s5, [#allocation5]  }
 0x2ad   : > { %1200 = dma.done.wait (%p913_p9), [#allocation5], 128  }
 0x2ae   : > { %1202 = vsyncadd (%p913_p9), [#allocation5], 4294967168 }
 0x2af PF: > { %s22_s27 = sadd.s32 1, %s1243_s27   ;;  %s1663_s14 = sld [smem:[#allocation14_spill]] }
 0x2b0   : > { %p19_p8 = scmp.ge.s32.totalorder %s22_s27, 4   ;;  %s1664_s18 = smov %s1211_s19 }
 0x2b1   : > { %s1665_s19 = smov %s1215_s20  ;;  %s1666_s20 = smov %s1362_s9 }
 0x2b2   : > { %s1667_s21 = smov %s1223_s22  ;;  %s1610_s22 = smov 0  }
 0x2b3   : > { %s1668_s23 = smov %s1231_s24  ;;  %s1615_s24 = smov 0  }
 0x2b4   : > { %s1669_s25 = smov %s1239_s26  ;;  %21 = sbr.rel (!%p19_p8) target bundleno = 11 (0xb), region = 124 }
 0x2b5   : > { %s1670_s26 = smov %s1663_s14 }
 0x2bb   :  { %593 = vsyncpa [#allocation4], 1 }
 0x2bc   :  { %595 = vsyncpa [#allocation4 + $0x1], 1 }
 0x2bd   :  { %596 = vsyncpa [#allocation7], 1 }
 0x2be   :  { %598 = vsyncpa [#allocation7 + $0x1], 1 }
 0x2bf   :  { %599 = vsyncpa [#allocation5], 1 }
 0x2c0   :  { %601 = vsyncpa [#allocation5 + $0x1], 1 }

</bundles_post_ra>
